<compile_context>
chip_gen: v6e
topology: v6e:2x2x1
jax: 0.10.0
libtpu: 0.0.40
codegen_flags: <defaults>
</compile_context>

<pallas_src>
import math

import jax
import jax.numpy as jnp
from jax.experimental import pallas as pl
from jax.experimental.pallas import tpu as pltpu

_LANE = 128
_SUB = 8


def _ceil_to(x, m):
  return ((x + m - 1) // m) * m


def _vmem_limit_bytes():
  """Generation-aware scoped-VMEM budget (~3/4 of physical, capped at 96 MiB)."""
  cap = 64 * 1024 * 1024
  try:
    info = pltpu.get_tpu_info()
    c = getattr(info, "vmem_capacity_bytes", None)
    if c:
      cap = int(c)
  except Exception:
    pass
  return int(min(max(cap * 3 // 4, 32 * 1024 * 1024), 96 * 1024 * 1024))


def _make_kernel(*, B, TB, NB, ND, TR, K, G):
  """Builds the fused CE + low-rank-MVN-prior kernel (static shapes closed over)."""
  inv_b = 1.0 / float(B)

  def kernel(scal_ref,      # SMEM (2,)       : [half_const, N]
             logits_ref,    # VMEM (TB, C)    : batch tile of logits
             targets_ref,   # VMEM (BP, 1)    : all targets, resident, int32
             params_ref,    # VMEM (TR, 128)
             loc_ref,       # VMEM (TR, 128)
             idiag_ref,     # VMEM (TR, 128)  : 1 / cov_diag (padding = 0)
             a_ref,         # VMEM (K, TR, 128) : L_cap^-1 W^T D^-1 tile
             out_ref,       # VMEM (1, 3)     : [loss, nll, prior]
             ce_acc,        # VMEM (TB, 1)    f32  per-row CE partials
             t1_acc,        # VMEM (8, 128)   f32  term1 partials
             z_acc):        # VMEM (K, 8, 128) f32  z partials
    i = pl.program_id(0)

    @pl.when(i == 0)
    def _init():
      ce_acc[...] = jnp.zeros_like(ce_acc)
      t1_acc[...] = jnp.zeros_like(t1_acc)
      z_acc[...] = jnp.zeros_like(z_acc)

    # ---- cross entropy: per-row (logsumexp - picked) for this batch tile ----
    @pl.when(i < NB)
    def _ce():
      logits = logits_ref[...].astype(jnp.float32)              # (TB, C)
      start = pl.multiple_of(i * TB, TB)
      tgt = targets_ref[pl.ds(start, TB), :]                    # (TB, 1) int32
      row_max = jnp.max(logits, axis=-1, keepdims=True)
      shifted = logits - row_max                                # shift-invariant form
      lse_s = jnp.log(jnp.sum(jnp.exp(shifted), axis=-1, keepdims=True))
      col = jax.lax.broadcasted_iota(jnp.int32, logits.shape, 1)
      # TODO(synk): out-of-range targets silently contribute 0 here (PyTorch errors).
      picked_s = jnp.sum(jnp.where(col == tgt, shifted, 0.0), axis=-1, keepdims=True)
      row = jax.lax.broadcasted_iota(jnp.int32, (TB, 1), 0) + i * TB
      ce_acc[...] = ce_acc[...] + jnp.where(row < B, lse_s - picked_s, 0.0)

    # ---- low-rank MVN Mahalanobis partials: VPU only, reductions deferred ----
    @pl.when(i < ND)
    def _prior():
      diff = params_ref[...] - loc_ref[...]                     # (TR, 128)
      sdiff = diff * idiag_ref[...]                             # D^-1 (x - mu)
      t1_acc[...] = t1_acc[...] + jnp.sum(
          (diff * sdiff).reshape(TR // _SUB, _SUB, _LANE), axis=0)
      # z_k partials: element-wise products collapsed to one vreg per k via VPU adds.
      # TODO(synk): for large K (>= ~16) drive this through jnp.dot on the MXU.
      for kk in range(K):
        prod = a_ref[kk] * diff                                 # (TR, 128)
        z_acc[kk, :, :] = z_acc[kk, :, :] + jnp.sum(
            prod.reshape(TR // _SUB, _SUB, _LANE), axis=0)

    # ---- finalize: single cross-lane reduce, Woodbury term2, clamp, combine ----
    @pl.when(i == G - 1)
    def _fin():
      nll = jnp.sum(ce_acc[...], keepdims=True) * inv_b         # (1, 1)
      term1 = jnp.sum(t1_acc[...], keepdims=True)               # (1, 1)
      term2 = jnp.zeros((1, 1), jnp.float32)
      for kk in range(K):
        zk = jnp.sum(z_acc[kk, :, :], keepdims=True)            # (1, 1)
        term2 = term2 + zk * zk
      maha = term1 - term2
      log_prob = scal_ref[0] - 0.5 * maha                       # half_const - 0.5*maha
      prior = jnp.clip(log_prob / scal_ref[1], -1e20, 1e20)
      loss = nll - prior
      lane = jax.lax.broadcasted_iota(jnp.int32, (1, 3), 1)
      out_ref[...] = jnp.where(lane == 0, loss,
                               jnp.where(lane == 1, nll, prior))

  return kernel


class GaussianPriorCELossShifted:
  """JAX/Pallas port. `ce` is assumed to be nn.CrossEntropyLoss() (mean reduction)."""

  def __init__(self, loc, cov_factor, cov_diag):
    loc = jnp.asarray(loc, jnp.float32)
    cov_factor = jnp.asarray(cov_factor, jnp.float32)
    cov_diag = jnp.asarray(cov_diag, jnp.float32)
    d = loc.shape[0]
    k = cov_factor.shape[1]
    self.number_of_params = d
    self.k = k
    self._vmem_limit = _vmem_limit_bytes()

    # Init-time K x K precompute (mirrors PyTorch LowRankMultivariateNormal.__init__).
    inv_diag = 1.0 / cov_diag                                    # (D,)
    wt_dinv = cov_factor.T * inv_diag[None, :]                   # (K, D)
    capacitance = jnp.eye(k, dtype=jnp.float32) + wt_dinv @ cov_factor
    l_cap = jnp.linalg.cholesky(capacitance)                     # lower (K, K)
    log_det = jnp.sum(jnp.log(cov_diag)) + 2.0 * jnp.sum(jnp.log(jnp.diag(l_cap)))
    a = jax.scipy.linalg.solve_triangular(l_cap, wt_dinv, lower=True)   # (K, D)
    self._half_const = jnp.asarray(
        -0.5 * (d * math.log(2.0 * math.pi) + log_det), jnp.float32)

    # --- dense lane layout for the D axis: (rows, 128), rows multiple of 8 & TR ---
    dp0 = _ceil_to(d, _SUB * _LANE)
    r = dp0 // _LANE                                             # multiple of 8
    d_buf_budget = min(8 * 1024 * 1024, self._vmem_limit // 6)   # per D-tile buffer
    tr = d_buf_budget // max(1, (3 + k) * _LANE * 4)
    tr = max(_SUB, min(2048, (tr // _SUB) * _SUB))
    tr = min(tr, r)
    rp = _ceil_to(r, tr)
    self._tr, self._rp, self._nd = tr, rp, rp // tr
    self._dp = rp * _LANE
    # TODO(synk): optionally store A (and inv_cov_diag) in bf16 to halve HBM traffic
    #             on v5e once re-validated against the 1e-4 tolerance.

    def _dense(v, pad_value):
      return jnp.pad(v, (0, self._dp - d),
                     constant_values=pad_value).reshape(rp, _LANE)

    self._loc = _dense(loc, 0.0)
    self._inv_cov_diag = _dense(inv_diag, 0.0)   # padding 0 (diff pads 0 -> contributes 0)
    self._a = jnp.pad(a, ((0, 0), (0, self._dp - d))).reshape(k, rp, _LANE)

  def __call__(self, logits, targets, N, params):
    logits = jnp.asarray(logits)             # keep HBM dtype; kernel casts to f32
    b, c = logits.shape
    k = self.k
    tr, rp, nd = self._tr, self._rp, self._nd

    # --- batch tiling for the CE term: sized from actual dtype + VMEM budget ---
    itemsize = jnp.dtype(logits.dtype).itemsize
    d_stream_bytes = 2 * (3 + k) * tr * _LANE * 4           # double-buffered D tiles
    logits_budget = (self._vmem_limit - d_stream_bytes - 4 * 1024 * 1024) // 2
    logits_budget = max(1 * 1024 * 1024, min(16 * 1024 * 1024, logits_budget))
    tb = logits_budget // max(1, c * itemsize)
    tb = max(_SUB, min(2048, (tb // _SUB) * _SUB))
    tb = min(tb, _ceil_to(b, _SUB))
    bp = _ceil_to(b, tb)
    nb = bp // tb
    g = max(nb, nd)

    # --- pad / lay out inputs ---
    if bp != b:
      logits = jnp.pad(logits, ((0, bp - b), (0, 0)))
    targets2d = jnp.pad(jnp.asarray(targets, jnp.int32), (0, bp - b)).reshape(bp, 1)
    params2d = jnp.pad(jnp.asarray(params, jnp.float32),
                       (0, self._dp - self.number_of_params)).reshape(rp, _LANE)
    scalars = jnp.stack([self._half_const,
                         jnp.asarray(N, jnp.float32).reshape(())]).astype(jnp.float32)

    kernel = _make_kernel(B=b, TB=tb, NB=nb, ND=nd, TR=tr, K=k, G=g)

    bytes_accessed = int(logits.size) * itemsize + 4 * bp \
        + 4 * (3 + k) * rp * _LANE + 64
    cost = pl.CostEstimate(
        flops=5 * bp * c + (2 * k + 4) * rp * _LANE + 64,
        transcendentals=bp * c + bp,
        bytes_accessed=bytes_accessed)

    smem = pl.BlockSpec(memory_space=pltpu.MemorySpace.SMEM)
    out = pl.pallas_call(
        kernel,
        out_shape=jax.ShapeDtypeStruct((1, 3), jnp.float32),
        grid=(g,),
        in_specs=[
            smem,                                                              # scalars
            pl.BlockSpec((tb, c), lambda i: (jnp.minimum(i, nb - 1), 0)),      # logits
            pl.BlockSpec((bp, 1), lambda i: (0, 0)),                           # targets (resident)
            pl.BlockSpec((tr, _LANE), lambda i: (jnp.minimum(i, nd - 1), 0)),  # params
            pl.BlockSpec((tr, _LANE), lambda i: (jnp.minimum(i, nd - 1), 0)),  # loc
            pl.BlockSpec((tr, _LANE), lambda i: (jnp.minimum(i, nd - 1), 0)),  # 1/cov_diag
            pl.BlockSpec((k, tr, _LANE),
                         lambda i: (0, jnp.minimum(i, nd - 1), 0)),            # A
        ],
        out_specs=pl.BlockSpec((1, 3), lambda i: (0, 0)),
        scratch_shapes=[pltpu.VMEM((tb, 1), jnp.float32),          # per-row CE sums
                        pltpu.VMEM((_SUB, _LANE), jnp.float32),    # term1 partials
                        pltpu.VMEM((k, _SUB, _LANE), jnp.float32)],  # z partials
        compiler_params=pltpu.CompilerParams(
            dimension_semantics=("arbitrary",),            # single reduction axis
            vmem_limit_bytes=self._vmem_limit),
        cost_estimate=cost,
    )(scalars, logits, targets2d, params2d, self._loc, self._inv_cov_diag, self._a)

    return {"loss": out[0, 0], "nll": out[0, 1], "prior": out[0, 2]}


if __name__ == "__main__":
  key = jax.random.PRNGKey(0)
  k1, k2, k3, k4, k5, k6 = jax.random.split(key, 6)
  B, C, D, K = 8, 16, 32, 4
  N = 100.0

  logits = jax.random.normal(k1, (B, C), jnp.float32)
  targets = jax.random.randint(k2, (B,), 0, C, dtype=jnp.int32)
  loc = jax.random.normal(k3, (D,), jnp.float32)
  cov_factor = 0.3 * jax.random.normal(k4, (D, K), jnp.float32)
  cov_diag = jax.random.uniform(k5, (D,), jnp.float32, minval=0.5, maxval=1.5)
  params = loc + 0.1 * jax.random.normal(k6, (D,), jnp.float32)

  model = GaussianPriorCELossShifted(loc, cov_factor, cov_diag)
  out = model(logits, targets, N, params)
  jax.block_until_ready(out)

  # Pure-JAX dense reference for a sanity check.
  lse = jax.scipy.special.logsumexp(logits, axis=-1)
  nll_ref = jnp.mean(lse - logits[jnp.arange(B), targets])
  cov = cov_factor @ cov_factor.T + jnp.diag(cov_diag)
  diff = params - loc
  maha = diff @ jnp.linalg.solve(cov, diff)
  logdet = jnp.linalg.slogdet(cov)[1]
  logp = -0.5 * (D * jnp.log(2.0 * jnp.pi) + logdet + maha)
  prior_ref = jnp.clip(logp / N, -1e20, 1e20)
  loss_ref = nll_ref - prior_ref

  assert jnp.allclose(out["nll"], nll_ref, rtol=1e-4, atol=1e-4)
  assert jnp.allclose(out["prior"], prior_ref, rtol=1e-4, atol=1e-4)
  assert jnp.allclose(out["loss"], loss_ref, rtol=1e-4, atol=1e-4)
  print("KERNEL_OK")
</pallas_src>

<mosaic_0001>
module attributes {stable_mosaic.version = 11 : i64} {
  func.func @kernel(%arg0: i32, %arg1: memref<2xf32, #tpu.memory_space<smem>>, %arg2: memref<8x16xf32, #tpu.memory_space<vmem>>, %arg3: memref<8x1xi32, #tpu.memory_space<vmem>>, %arg4: memref<8x128xf32, #tpu.memory_space<vmem>>, %arg5: memref<8x128xf32, #tpu.memory_space<vmem>>, %arg6: memref<8x128xf32, #tpu.memory_space<vmem>>, %arg7: memref<4x8x128xf32, #tpu.memory_space<vmem>>, %arg8: memref<1x3xf32, #tpu.memory_space<vmem>>, %arg9: memref<8x1xf32, #tpu.memory_space<vmem>>, %arg10: memref<8x128xf32, #tpu.memory_space<vmem>>, %arg11: memref<4x8x128xf32, #tpu.memory_space<vmem>>) attributes {dimension_semantics = [#tpu.dimension_semantics<arbitrary>], iteration_bounds = array<i64: 1>, scalar_prefetch = 0 : i64, scratch_operands = 3 : i64, tpu.core_type = #tpu.core_type<tc>, window_params = [{transform_indices = @transform_0, window_bounds = array<i64: 2>}, {transform_indices = @transform_1, window_bounds = array<i64: 8, 16>}, {pipeline_mode = #tpu.pipeline_mode<synchronous>, transform_indices = @transform_2, window_bounds = array<i64: 8, 1>}, {transform_indices = @transform_3, window_bounds = array<i64: 8, 128>}, {transform_indices = @transform_4, window_bounds = array<i64: 8, 128>}, {transform_indices = @transform_5, window_bounds = array<i64: 8, 128>}, {transform_indices = @transform_6, window_bounds = array<i64: 4, 8, 128>}, {pipeline_mode = #tpu.pipeline_mode<synchronous>, transform_indices = @transform_7, window_bounds = array<i64: 1, 3>}]} {
    %c0_i32 = arith.constant 0 : i32
    %0 = arith.cmpi eq, %arg0, %c0_i32 : i32
    %1 = arith.extui %0 : i1 to i32
    %c0_i32_0 = arith.constant 0 : i32
    %2 = arith.cmpi ne, %1, %c0_i32_0 : i32
    scf.if %2 {
      %cst = arith.constant 0.000000e+00 : f32
      %12 = vector.broadcast %cst : f32 to vector<8x1xf32>
      %c0 = arith.constant 0 : index
      %c0_6 = arith.constant 0 : index
      %13 = vector.load %arg9[%c0, %c0_6] : memref<8x1xf32, #tpu.memory_space<vmem>>, vector<8x1xf32>
      tpu.vector_store %arg9[%c0, %c0_6], %12 {strides = array<i32>} : memref<8x1xf32, #tpu.memory_space<vmem>>, vector<8x1xf32>,
      %cst_7 = arith.constant 0.000000e+00 : f32
      %14 = vector.broadcast %cst_7 : f32 to vector<8x128xf32>
      %c0_8 = arith.constant 0 : index
      %c0_9 = arith.constant 0 : index
      %15 = vector.load %arg10[%c0_8, %c0_9] : memref<8x128xf32, #tpu.memory_space<vmem>>, vector<8x128xf32>
      tpu.vector_store %arg10[%c0_8, %c0_9], %14 {strides = array<i32>} : memref<8x128xf32, #tpu.memory_space<vmem>>, vector<8x128xf32>,
      %cst_10 = arith.constant 0.000000e+00 : f32
      %16 = vector.broadcast %cst_10 : f32 to vector<4x8x128xf32>
      %c0_11 = arith.constant 0 : index
      %c0_12 = arith.constant 0 : index
      %c0_13 = arith.constant 0 : index
      %17 = vector.load %arg11[%c0_11, %c0_12, %c0_13] : memref<4x8x128xf32, #tpu.memory_space<vmem>>, vector<4x8x128xf32>
      tpu.vector_store %arg11[%c0_11, %c0_12, %c0_13], %16 {strides = array<i32>} : memref<4x8x128xf32, #tpu.memory_space<vmem>>, vector<4x8x128xf32>,
    } else {
    }
    %c1_i32 = arith.constant 1 : i32
    %3 = arith.cmpi slt, %arg0, %c1_i32 : i32
    %4 = arith.extui %3 : i1 to i32
    %c0_i32_1 = arith.constant 0 : i32
    %5 = arith.cmpi ne, %4, %c0_i32_1 : i32
    scf.if %5 {
      %c0 = arith.constant 0 : index
      %c0_6 = arith.constant 0 : index
      %12 = vector.load %arg2[%c0, %c0_6] : memref<8x16xf32, #tpu.memory_space<vmem>>, vector<8x16xf32>
      %c8_i32 = arith.constant 8 : i32
      %13 = arith.muli %arg0, %c8_i32 : i32
      %14 = tpu.assume_multiple %13, 8 : i32
      %15 = arith.index_cast %14 : i32 to index
      %c0_7 = arith.constant 0 : index
      %16 = vector.load %arg3[%15, %c0_7] : memref<8x1xi32, #tpu.memory_space<vmem>>, vector<8x1xi32>
      %cst = arith.constant dense<0xFF800000> : vector<8xf32>
      %17 = vector.multi_reduction <maximumf>, %12, %cst [1] : vector<8x16xf32> to vector<8xf32>
      %18 = vector.shape_cast %17 : vector<8xf32> to vector<8x1xf32>
      %19 = vector.broadcast %18 : vector<8x1xf32> to vector<8x16xf32>
      %20 = arith.subf %12, %19 : vector<8x16xf32>
      %21 = math.exp %20 : vector<8x16xf32>
      %cst_8 = arith.constant dense<0.000000e+00> : vector<8xf32>
      %22 = vector.multi_reduction <add>, %21, %cst_8 [1] : vector<8x16xf32> to vector<8xf32>
      %23 = vector.shape_cast %22 : vector<8xf32> to vector<8x1xf32>
      %24 = math.log %23 : vector<8x1xf32>
      %25 = tpu.iota {dimensions = array<i32: 1>} : vector<8x16xi32>
      %26 = vector.broadcast %16 : vector<8x1xi32> to vector<8x16xi32>
      %27 = arith.cmpi eq, %25, %26 : vector<8x16xi32>
      %cst_9 = arith.constant 0.000000e+00 : f32
      %28 = vector.broadcast %cst_9 : f32 to vector<8x16xf32>
      %29 = arith.select %27, %20, %28 : vector<8x16xi1>, vector<8x16xf32>
      %cst_10 = arith.constant dense<0.000000e+00> : vector<8xf32>
      %30 = vector.multi_reduction <add>, %29, %cst_10 [1] : vector<8x16xf32> to vector<8xf32>
      %31 = vector.shape_cast %30 : vector<8xf32> to vector<8x1xf32>
      %32 = tpu.iota {dimensions = array<i32: 0>} : vector<8x1xi32>
      %c8_i32_11 = arith.constant 8 : i32
      %33 = arith.muli %arg0, %c8_i32_11 : i32
      %34 = vector.broadcast %33 : i32 to vector<8x1xi32>
      %35 = arith.addi %32, %34 : vector<8x1xi32>
      %c0_12 = arith.constant 0 : index
      %c0_13 = arith.constant 0 : index
      %36 = vector.load %arg9[%c0_12, %c0_13] : memref<8x1xf32, #tpu.memory_space<vmem>>, vector<8x1xf32>
      %c8_i32_14 = arith.constant 8 : i32
      %37 = vector.broadcast %c8_i32_14 : i32 to vector<8x1xi32>
      %38 = arith.cmpi slt, %35, %37 : vector<8x1xi32>
      %39 = arith.subf %24, %31 : vector<8x1xf32>
      %cst_15 = arith.constant 0.000000e+00 : f32
      %40 = vector.broadcast %cst_15 : f32 to vector<8x1xf32>
      %41 = arith.select %38, %39, %40 : vector<8x1xi1>, vector<8x1xf32>
      %42 = arith.addf %36, %41 : vector<8x1xf32>
      %c0_16 = arith.constant 0 : index
      %c0_17 = arith.constant 0 : index
      %43 = vector.load %arg9[%c0_16, %c0_17] : memref<8x1xf32, #tpu.memory_space<vmem>>, vector<8x1xf32>
      tpu.vector_store %arg9[%c0_16, %c0_17], %42 {strides = array<i32>} : memref<8x1xf32, #tpu.memory_space<vmem>>, vector<8x1xf32>,
    } else {
    }
    %c1_i32_2 = arith.constant 1 : i32
    %6 = arith.cmpi slt, %arg0, %c1_i32_2 : i32
    %7 = arith.extui %6 : i1 to i32
    %c0_i32_3 = arith.constant 0 : i32
    %8 = arith.cmpi ne, %7, %c0_i32_3 : i32
    scf.if %8 {
      %c0 = arith.constant 0 : index
      %c0_6 = arith.constant 0 : index
      %12 = vector.load %arg4[%c0, %c0_6] : memref<8x128xf32, #tpu.memory_space<vmem>>, vector<8x128xf32>
      %c0_7 = arith.constant 0 : index
      %c0_8 = arith.constant 0 : index
      %13 = vector.load %arg5[%c0_7, %c0_8] : memref<8x128xf32, #tpu.memory_space<vmem>>, vector<8x128xf32>
      %14 = arith.subf %12, %13 : vector<8x128xf32>
      %c0_9 = arith.constant 0 : index
      %c0_10 = arith.constant 0 : index
      %15 = vector.load %arg6[%c0_9, %c0_10] : memref<8x128xf32, #tpu.memory_space<vmem>>, vector<8x128xf32>
      %16 = arith.mulf %14, %15 : vector<8x128xf32>
      %c0_11 = arith.constant 0 : index
      %c0_12 = arith.constant 0 : index
      %17 = vector.load %arg10[%c0_11, %c0_12] : memref<8x128xf32, #tpu.memory_space<vmem>>, vector<8x128xf32>
      %18 = arith.mulf %14, %16 : vector<8x128xf32>
      %19 = vector.shape_cast %18 : vector<8x128xf32> to vector<1x8x128xf32>
      %cst = arith.constant dense<0.000000e+00> : vector<8x128xf32>
      %20 = vector.multi_reduction <add>, %19, %cst [0] : vector<1x8x128xf32> to vector<8x128xf32>
      %21 = arith.addf %17, %20 : vector<8x128xf32>
      %c0_13 = arith.constant 0 : index
      %c0_14 = arith.constant 0 : index
      %22 = vector.load %arg10[%c0_13, %c0_14] : memref<8x128xf32, #tpu.memory_space<vmem>>, vector<8x128xf32>
      tpu.vector_store %arg10[%c0_13, %c0_14], %21 {strides = array<i32>} : memref<8x128xf32, #tpu.memory_space<vmem>>, vector<8x128xf32>,
      %c0_15 = arith.constant 0 : index
      %c0_16 = arith.constant 0 : index
      %c0_17 = arith.constant 0 : index
      %23 = vector.load %arg7[%c0_15, %c0_16, %c0_17] : memref<4x8x128xf32, #tpu.memory_space<vmem>>, vector<1x8x128xf32>
      %24 = vector.shape_cast %23 : vector<1x8x128xf32> to vector<8x128xf32>
      %25 = arith.mulf %24, %14 : vector<8x128xf32>
      %c0_18 = arith.constant 0 : index
      %c0_19 = arith.constant 0 : index
      %c0_20 = arith.constant 0 : index
      %26 = vector.load %arg11[%c0_18, %c0_19, %c0_20] : memref<4x8x128xf32, #tpu.memory_space<vmem>>, vector<1x8x128xf32>
      %27 = vector.shape_cast %26 : vector<1x8x128xf32> to vector<8x128xf32>
      %28 = vector.shape_cast %25 : vector<8x128xf32> to vector<1x8x128xf32>
      %cst_21 = arith.constant dense<0.000000e+00> : vector<8x128xf32>
      %29 = vector.multi_reduction <add>, %28, %cst_21 [0] : vector<1x8x128xf32> to vector<8x128xf32>
      %30 = arith.addf %27, %29 : vector<8x128xf32>
      %c0_22 = arith.constant 0 : index
      %c0_23 = arith.constant 0 : index
      %c0_24 = arith.constant 0 : index
      %31 = vector.load %arg11[%c0_22, %c0_23, %c0_24] : memref<4x8x128xf32, #tpu.memory_space<vmem>>, vector<1x8x128xf32>
      %32 = vector.shape_cast %31 : vector<1x8x128xf32> to vector<8x128xf32>
      %33 = vector.shape_cast %30 : vector<8x128xf32> to vector<1x8x128xf32>
      tpu.vector_store %arg11[%c0_22, %c0_23, %c0_24], %33 {strides = array<i32>} : memref<4x8x128xf32, #tpu.memory_space<vmem>>, vector<1x8x128xf32>,
      %c1 = arith.constant 1 : index
      %c0_25 = arith.constant 0 : index
      %c0_26 = arith.constant 0 : index
      %34 = vector.load %arg7[%c1, %c0_25, %c0_26] : memref<4x8x128xf32, #tpu.memory_space<vmem>>, vector<1x8x128xf32>
      %35 = vector.shape_cast %34 : vector<1x8x128xf32> to vector<8x128xf32>
      %36 = arith.mulf %35, %14 : vector<8x128xf32>
      %c1_27 = arith.constant 1 : index
      %c0_28 = arith.constant 0 : index
      %c0_29 = arith.constant 0 : index
      %37 = vector.load %arg11[%c1_27, %c0_28, %c0_29] : memref<4x8x128xf32, #tpu.memory_space<vmem>>, vector<1x8x128xf32>
      %38 = vector.shape_cast %37 : vector<1x8x128xf32> to vector<8x128xf32>
      %39 = vector.shape_cast %36 : vector<8x128xf32> to vector<1x8x128xf32>
      %cst_30 = arith.constant dense<0.000000e+00> : vector<8x128xf32>
      %40 = vector.multi_reduction <add>, %39, %cst_30 [0] : vector<1x8x128xf32> to vector<8x128xf32>
      %41 = arith.addf %38, %40 : vector<8x128xf32>
      %c1_31 = arith.constant 1 : index
      %c0_32 = arith.constant 0 : index
      %c0_33 = arith.constant 0 : index
      %42 = vector.load %arg11[%c1_31, %c0_32, %c0_33] : memref<4x8x128xf32, #tpu.memory_space<vmem>>, vector<1x8x128xf32>
      %43 = vector.shape_cast %42 : vector<1x8x128xf32> to vector<8x128xf32>
      %44 = vector.shape_cast %41 : vector<8x128xf32> to vector<1x8x128xf32>
      tpu.vector_store %arg11[%c1_31, %c0_32, %c0_33], %44 {strides = array<i32>} : memref<4x8x128xf32, #tpu.memory_space<vmem>>, vector<1x8x128xf32>,
      %c2 = arith.constant 2 : index
      %c0_34 = arith.constant 0 : index
      %c0_35 = arith.constant 0 : index
      %45 = vector.load %arg7[%c2, %c0_34, %c0_35] : memref<4x8x128xf32, #tpu.memory_space<vmem>>, vector<1x8x128xf32>
      %46 = vector.shape_cast %45 : vector<1x8x128xf32> to vector<8x128xf32>
      %47 = arith.mulf %46, %14 : vector<8x128xf32>
      %c2_36 = arith.constant 2 : index
      %c0_37 = arith.constant 0 : index
      %c0_38 = arith.constant 0 : index
      %48 = vector.load %arg11[%c2_36, %c0_37, %c0_38] : memref<4x8x128xf32, #tpu.memory_space<vmem>>, vector<1x8x128xf32>
      %49 = vector.shape_cast %48 : vector<1x8x128xf32> to vector<8x128xf32>
      %50 = vector.shape_cast %47 : vector<8x128xf32> to vector<1x8x128xf32>
      %cst_39 = arith.constant dense<0.000000e+00> : vector<8x128xf32>
      %51 = vector.multi_reduction <add>, %50, %cst_39 [0] : vector<1x8x128xf32> to vector<8x128xf32>
      %52 = arith.addf %49, %51 : vector<8x128xf32>
      %c2_40 = arith.constant 2 : index
      %c0_41 = arith.constant 0 : index
      %c0_42 = arith.constant 0 : index
      %53 = vector.load %arg11[%c2_40, %c0_41, %c0_42] : memref<4x8x128xf32, #tpu.memory_space<vmem>>, vector<1x8x128xf32>
      %54 = vector.shape_cast %53 : vector<1x8x128xf32> to vector<8x128xf32>
      %55 = vector.shape_cast %52 : vector<8x128xf32> to vector<1x8x128xf32>
      tpu.vector_store %arg11[%c2_40, %c0_41, %c0_42], %55 {strides = array<i32>} : memref<4x8x128xf32, #tpu.memory_space<vmem>>, vector<1x8x128xf32>,
      %c3 = arith.constant 3 : index
      %c0_43 = arith.constant 0 : index
      %c0_44 = arith.constant 0 : index
      %56 = vector.load %arg7[%c3, %c0_43, %c0_44] : memref<4x8x128xf32, #tpu.memory_space<vmem>>, vector<1x8x128xf32>
      %57 = vector.shape_cast %56 : vector<1x8x128xf32> to vector<8x128xf32>
      %58 = arith.mulf %57, %14 : vector<8x128xf32>
      %c3_45 = arith.constant 3 : index
      %c0_46 = arith.constant 0 : index
      %c0_47 = arith.constant 0 : index
      %59 = vector.load %arg11[%c3_45, %c0_46, %c0_47] : memref<4x8x128xf32, #tpu.memory_space<vmem>>, vector<1x8x128xf32>
      %60 = vector.shape_cast %59 : vector<1x8x128xf32> to vector<8x128xf32>
      %61 = vector.shape_cast %58 : vector<8x128xf32> to vector<1x8x128xf32>
      %cst_48 = arith.constant dense<0.000000e+00> : vector<8x128xf32>
      %62 = vector.multi_reduction <add>, %61, %cst_48 [0] : vector<1x8x128xf32> to vector<8x128xf32>
      %63 = arith.addf %60, %62 : vector<8x128xf32>
      %c3_49 = arith.constant 3 : index
      %c0_50 = arith.constant 0 : index
      %c0_51 = arith.constant 0 : index
      %64 = vector.load %arg11[%c3_49, %c0_50, %c0_51] : memref<4x8x128xf32, #tpu.memory_space<vmem>>, vector<1x8x128xf32>
      %65 = vector.shape_cast %64 : vector<1x8x128xf32> to vector<8x128xf32>
      %66 = vector.shape_cast %63 : vector<8x128xf32> to vector<1x8x128xf32>
      tpu.vector_store %arg11[%c3_49, %c0_50, %c0_51], %66 {strides = array<i32>} : memref<4x8x128xf32, #tpu.memory_space<vmem>>, vector<1x8x128xf32>,
    } else {
    }
    %c0_i32_4 = arith.constant 0 : i32
    %9 = arith.cmpi eq, %arg0, %c0_i32_4 : i32
    %10 = arith.extui %9 : i1 to i32
    %c0_i32_5 = arith.constant 0 : i32
    %11 = arith.cmpi ne, %10, %c0_i32_5 : i32
    scf.if %11 {
      %c0 = arith.constant 0 : index
      %c0_6 = arith.constant 0 : index
      %12 = vector.load %arg9[%c0, %c0_6] : memref<8x1xf32, #tpu.memory_space<vmem>>, vector<8x1xf32>
      %13 = vector.shape_cast %12 : vector<8x1xf32> to vector<1x8x1xf32>
      %cst = arith.constant dense<0.000000e+00> : vector<1xf32>
      %14 = vector.multi_reduction <add>, %13, %cst [1, 2] : vector<1x8x1xf32> to vector<1xf32>
      %15 = vector.shape_cast %14 : vector<1xf32> to vector<1x1x1xf32>
      %16 = vector.extract %15[0, 0, 0] : f32 from vector<1x1x1xf32>
      %17 = vector.broadcast %16 : f32 to vector<1x1xf32>
      %cst_7 = arith.constant 1.250000e-01 : f32
      %18 = vector.broadcast %cst_7 : f32 to vector<1x1xf32>
      %19 = arith.mulf %17, %18 : vector<1x1xf32>
      %c0_8 = arith.constant 0 : index
      %c0_9 = arith.constant 0 : index
      %20 = vector.load %arg10[%c0_8, %c0_9] : memref<8x128xf32, #tpu.memory_space<vmem>>, vector<8x128xf32>
      %21 = vector.shape_cast %20 : vector<8x128xf32> to vector<1x8x128xf32>
      %cst_10 = arith.constant dense<0.000000e+00> : vector<1xf32>
      %22 = vector.multi_reduction <add>, %21, %cst_10 [1, 2] : vector<1x8x128xf32> to vector<1xf32>
      %23 = vector.shape_cast %22 : vector<1xf32> to vector<1x1x1xf32>
      %24 = vector.extract %23[0, 0, 0] : f32 from vector<1x1x1xf32>
      %25 = vector.broadcast %24 : f32 to vector<1x1xf32>
      %cst_11 = arith.constant 0.000000e+00 : f32
      %26 = vector.broadcast %cst_11 : f32 to vector<1x1xf32>
      %c0_12 = arith.constant 0 : index
      %c0_13 = arith.constant 0 : index
      %c0_14 = arith.constant 0 : index
      %27 = vector.load %arg11[%c0_12, %c0_13, %c0_14] : memref<4x8x128xf32, #tpu.memory_space<vmem>>, vector<1x8x128xf32>
      %28 = vector.shape_cast %27 : vector<1x8x128xf32> to vector<8x128xf32>
      %29 = vector.shape_cast %28 : vector<8x128xf32> to vector<1x8x128xf32>
      %cst_15 = arith.constant dense<0.000000e+00> : vector<1xf32>
      %30 = vector.multi_reduction <add>, %29, %cst_15 [1, 2] : vector<1x8x128xf32> to vector<1xf32>
      %31 = vector.shape_cast %30 : vector<1xf32> to vector<1x1x1xf32>
      %32 = vector.extract %31[0, 0, 0] : f32 from vector<1x1x1xf32>
      %33 = vector.broadcast %32 : f32 to vector<1x1xf32>
      %34 = arith.mulf %33, %33 : vector<1x1xf32>
      %35 = arith.addf %26, %34 : vector<1x1xf32>
      %c1 = arith.constant 1 : index
      %c0_16 = arith.constant 0 : index
      %c0_17 = arith.constant 0 : index
      %36 = vector.load %arg11[%c1, %c0_16, %c0_17] : memref<4x8x128xf32, #tpu.memory_space<vmem>>, vector<1x8x128xf32>
      %37 = vector.shape_cast %36 : vector<1x8x128xf32> to vector<8x128xf32>
      %38 = vector.shape_cast %37 : vector<8x128xf32> to vector<1x8x128xf32>
      %cst_18 = arith.constant dense<0.000000e+00> : vector<1xf32>
      %39 = vector.multi_reduction <add>, %38, %cst_18 [1, 2] : vector<1x8x128xf32> to vector<1xf32>
      %40 = vector.shape_cast %39 : vector<1xf32> to vector<1x1x1xf32>
      %41 = vector.extract %40[0, 0, 0] : f32 from vector<1x1x1xf32>
      %42 = vector.broadcast %41 : f32 to vector<1x1xf32>
      %43 = arith.mulf %42, %42 : vector<1x1xf32>
      %44 = arith.addf %35, %43 : vector<1x1xf32>
      %c2 = arith.constant 2 : index
      %c0_19 = arith.constant 0 : index
      %c0_20 = arith.constant 0 : index
      %45 = vector.load %arg11[%c2, %c0_19, %c0_20] : memref<4x8x128xf32, #tpu.memory_space<vmem>>, vector<1x8x128xf32>
      %46 = vector.shape_cast %45 : vector<1x8x128xf32> to vector<8x128xf32>
      %47 = vector.shape_cast %46 : vector<8x128xf32> to vector<1x8x128xf32>
      %cst_21 = arith.constant dense<0.000000e+00> : vector<1xf32>
      %48 = vector.multi_reduction <add>, %47, %cst_21 [1, 2] : vector<1x8x128xf32> to vector<1xf32>
      %49 = vector.shape_cast %48 : vector<1xf32> to vector<1x1x1xf32>
      %50 = vector.extract %49[0, 0, 0] : f32 from vector<1x1x1xf32>
      %51 = vector.broadcast %50 : f32 to vector<1x1xf32>
      %52 = arith.mulf %51, %51 : vector<1x1xf32>
      %53 = arith.addf %44, %52 : vector<1x1xf32>
      %c3 = arith.constant 3 : index
      %c0_22 = arith.constant 0 : index
      %c0_23 = arith.constant 0 : index
      %54 = vector.load %arg11[%c3, %c0_22, %c0_23] : memref<4x8x128xf32, #tpu.memory_space<vmem>>, vector<1x8x128xf32>
      %55 = vector.shape_cast %54 : vector<1x8x128xf32> to vector<8x128xf32>
      %56 = vector.shape_cast %55 : vector<8x128xf32> to vector<1x8x128xf32>
      %cst_24 = arith.constant dense<0.000000e+00> : vector<1xf32>
      %57 = vector.multi_reduction <add>, %56, %cst_24 [1, 2] : vector<1x8x128xf32> to vector<1xf32>
      %58 = vector.shape_cast %57 : vector<1xf32> to vector<1x1x1xf32>
      %59 = vector.extract %58[0, 0, 0] : f32 from vector<1x1x1xf32>
      %60 = vector.broadcast %59 : f32 to vector<1x1xf32>
      %61 = arith.mulf %60, %60 : vector<1x1xf32>
      %62 = arith.addf %53, %61 : vector<1x1xf32>
      %63 = arith.subf %25, %62 : vector<1x1xf32>
      %c0_25 = arith.constant 0 : index
      %64 = memref.load %arg1[%c0_25] : memref<2xf32, #tpu.memory_space<smem>>
      %cst_26 = arith.constant 5.000000e-01 : f32
      %65 = vector.broadcast %cst_26 : f32 to vector<1x1xf32>
      %66 = arith.mulf %65, %63 : vector<1x1xf32>
      %67 = vector.broadcast %64 : f32 to vector<1x1xf32>
      %68 = arith.subf %67, %66 : vector<1x1xf32>
      %c1_27 = arith.constant 1 : index
      %69 = memref.load %arg1[%c1_27] : memref<2xf32, #tpu.memory_space<smem>>
      %70 = vector.broadcast %69 : f32 to vector<1x1xf32>
      %71 = arith.divf %68, %70 : vector<1x1xf32>
      %cst_28 = arith.constant -1.000000e+20 : f32
      %cst_29 = arith.constant 1.000000e+20 : f32
      %72 = vector.broadcast %cst_28 : f32 to vector<1x1xf32>
      %73 = arith.maximumf %72, %71 : vector<1x1xf32>
      %74 = vector.broadcast %cst_29 : f32 to vector<1x1xf32>
      %75 = arith.minimumf %74, %73 : vector<1x1xf32>
      %76 = arith.subf %19, %75 : vector<1x1xf32>
      %77 = tpu.iota {dimensions = array<i32: 1>} : vector<1x3xi32>
      %c0_i32_30 = arith.constant 0 : i32
      %78 = vector.broadcast %c0_i32_30 : i32 to vector<1x3xi32>
      %79 = arith.cmpi eq, %77, %78 : vector<1x3xi32>
      %c1_i32_31 = arith.constant 1 : i32
      %80 = vector.broadcast %c1_i32_31 : i32 to vector<1x3xi32>
      %81 = arith.cmpi eq, %77, %80 : vector<1x3xi32>
      %82 = vector.shape_cast %19 : vector<1x1xf32> to vector<1x1xf32>
      %83 = vector.broadcast %82 : vector<1x1xf32> to vector<1x3xf32>
      %84 = vector.shape_cast %75 : vector<1x1xf32> to vector<1x1xf32>
      %85 = vector.broadcast %84 : vector<1x1xf32> to vector<1x3xf32>
      %86 = arith.select %81, %83, %85 : vector<1x3xi1>, vector<1x3xf32>
      %87 = vector.shape_cast %76 : vector<1x1xf32> to vector<1x1xf32>
      %88 = vector.broadcast %87 : vector<1x1xf32> to vector<1x3xf32>
      %89 = arith.select %79, %88, %86 : vector<1x3xi1>, vector<1x3xf32>
      %c0_32 = arith.constant 0 : index
      %c0_33 = arith.constant 0 : index
      %90 = vector.load %arg8[%c0_32, %c0_33] : memref<1x3xf32, #tpu.memory_space<vmem>>, vector<1x3xf32>
      tpu.vector_store %arg8[%c0_32, %c0_33], %89 {strides = array<i32>} : memref<1x3xf32, #tpu.memory_space<vmem>>, vector<1x3xf32>,
    } else {
    }
    return
  }
  func.func @transform_0(%arg0: i32) -> i32 {
    %c0_i32 = arith.constant 0 : i32
    %c0_i32_0 = arith.constant 0 : i32
    return %c0_i32 : i32
  }
  func.func @transform_1(%arg0: i32) -> (i32, i32) {
    %c0_i32 = arith.constant 0 : i32
    %0 = arith.minsi %arg0, %c0_i32 : i32
    %c0_i32_0 = arith.constant 0 : i32
    %c0_i32_1 = arith.constant 0 : i32
    return %0, %c0_i32_0 : i32, i32
  }
  func.func @transform_2(%arg0: i32) -> (i32, i32) {
    %c0_i32 = arith.constant 0 : i32
    %c0_i32_0 = arith.constant 0 : i32
    %c0_i32_1 = arith.constant 0 : i32
    return %c0_i32, %c0_i32_0 : i32, i32
  }
  func.func @transform_3(%arg0: i32) -> (i32, i32) {
    %c0_i32 = arith.constant 0 : i32
    %0 = arith.minsi %arg0, %c0_i32 : i32
    %c0_i32_0 = arith.constant 0 : i32
    %c0_i32_1 = arith.constant 0 : i32
    return %0, %c0_i32_0 : i32, i32
  }
  func.func @transform_4(%arg0: i32) -> (i32, i32) {
    %c0_i32 = arith.constant 0 : i32
    %0 = arith.minsi %arg0, %c0_i32 : i32
    %c0_i32_0 = arith.constant 0 : i32
    %c0_i32_1 = arith.constant 0 : i32
    return %0, %c0_i32_0 : i32, i32
  }
  func.func @transform_5(%arg0: i32) -> (i32, i32) {
    %c0_i32 = arith.constant 0 : i32
    %0 = arith.minsi %arg0, %c0_i32 : i32
    %c0_i32_0 = arith.constant 0 : i32
    %c0_i32_1 = arith.constant 0 : i32
    return %0, %c0_i32_0 : i32, i32
  }
  func.func @transform_6(%arg0: i32) -> (i32, i32, i32) {
    %c0_i32 = arith.constant 0 : i32
    %0 = arith.minsi %arg0, %c0_i32 : i32
    %c0_i32_0 = arith.constant 0 : i32
    %c0_i32_1 = arith.constant 0 : i32
    %c0_i32_2 = arith.constant 0 : i32
    return %c0_i32_0, %0, %c0_i32_1 : i32, i32, i32
  }
  func.func @transform_7(%arg0: i32) -> (i32, i32) {
    %c0_i32 = arith.constant 0 : i32
    %c0_i32_0 = arith.constant 0 : i32
    %c0_i32_1 = arith.constant 0 : i32
    return %c0_i32, %c0_i32_0 : i32, i32
  }
}

</mosaic_0001>

<bundles_post_ra>
// kernel: tpu_custom_call.1
= control target key start
LH: loop header
LB: loop body
LE: loop exit
PB: predicated region body
PF: predicated region fallthrough
CT: control target
= control target key end

     0   :  { %12 = vsyncpa [#allocation8], 0  ;;  %s497_s0 = inlined_call_operand.hbm [shape: f32[2], index: 0, kind: input, shape index: {}]   ;;  %s498_s1 = inlined_call_operand.vmem [shape: f32[8,16], index: 1, kind: input, shape index: {}]   ;;  %s499_s2 = inlined_call_operand.vmem [shape: s32[8,1], index: 2, kind: input, shape index: {}]   ;;  %s500_s3 = inlined_call_operand.hbm [shape: f32[8,128], index: 3, kind: input, shape index: {}]   ;;  %s501_s4 = inlined_call_operand.vmem [shape: f32[8,128], index: 4, kind: input, shape index: {}]   ;;  %s502_s5 = inlined_call_operand.hbm [shape: f32[8,128], index: 5, kind: input, shape index: {}]   ;;  %s503_s6 = inlined_call_operand.hbm [shape: f32[4,8,128], index: 6, kind: input, shape index: {}]   ;;  %s504_s7 = inlined_call_operand.hbm [shape: f32[1,3], index: 7, kind: output, shape index: {}]  }
   0x1   :  { %13 = vsyncpa [#allocation6], 0 }
   0x2   :  { %14 = vsyncpa [#allocation11], 0 }
   0x3   :  { %15 = vsyncpa [#allocation7], 0  ;;  %s413_s24 = smov [#allocation10]   ;;  %s414_s26 = smov [#allocation9]  }
   0x4   :  { %s46_s25 = sshll.u32 %s413_s24, 4  ;;  %s34_s27 = sshll.u32 %s414_s26, 4  ;;  %s47_s25 = int_to_ptr.vmem [resolvable:$true] %s46_s25  ;;  %s35_s27 = int_to_ptr.vmem [resolvable:$true] %s34_s27 }
   0x5   :  { %s325_s28 = scalar_lea.vmem %s47_s25, 128  ;;  %p330_p1 = scmp.lt.s32.totalorder %s47_s25, %s47_s25 }
   0x6   :  { %p326_p0 = scmp.ne.s32.totalorder %s47_s25, %s325_s28  ;;  %p331_p2 = scmp.lt.s32.totalorder %s325_s28, %s325_s28 }
   0x8   :  { %p332_p3 = por %p331_p2, %p330_p1 }
   0xa   :  { %p333_p4 = pnand %p332_p3, %p326_p0 }
   0xc   :  { %336 = shalt.err (!%p333_p4)
}
   0xd   :  { %49 = dma.hbm_to_vmem [thread:$0]  %s502_s5, 128, %s47_s25, [#allocation11]  }
   0xe   :  { %s415_s8 = smov [#allocation5]   ;;  %s353_s11 = scalar_lea.vmem %s35_s27, 128 }
   0xf   :  { %23 = dma.hbm_to_smem %s497_s0, 16, %s415_s8, [#allocation8]  }
  0x10   :  { %p354_p5 = scmp.ne.s32.totalorder %s35_s27, %s353_s11  ;;  %p358_p6 = scmp.lt.s32.totalorder %s35_s27, %s35_s27 }
  0x11   :  { %p359_p7 = scmp.lt.s32.totalorder %s353_s11, %s353_s11 }
  0x13   :  { %p360_p8 = por %p359_p7, %p358_p6 }
  0x15   :  { %p361_p9 = pnand %p360_p8, %p354_p5 }
  0x17   :  { %364 = shalt.err (!%p361_p9)
}
  0x18   :  { %37 = dma.hbm_to_vmem [thread:$0]  %s500_s3, 128, %s35_s27, [#allocation6]  }
  0x19   :  { %s416_s14 = smov [#allocation12]  }
  0x1a   :  { %s55_s15 = sshll.u32 %s416_s14, 4  ;;  %s56_s15 = int_to_ptr.vmem [resolvable:$true] %s55_s15 }
  0x1b   :  { %s373_s5 = scalar_lea.vmem %s56_s15, 512  ;;  %p378_p11 = scmp.lt.s32.totalorder %s56_s15, %s56_s15 }
  0x1c   :  { %p374_p10 = scmp.ne.s32.totalorder %s56_s15, %s373_s5  ;;  %p379_p12 = scmp.lt.s32.totalorder %s373_s5, %s373_s5 }
  0x1e   :  { %p380_p13 = por %p379_p12, %p378_p11 }
  0x20   :  { %p381_p0 = pnand %p380_p13, %p374_p10 }
  0x22   :  { %384 = shalt.err (!%p381_p0)
}
  0x23   :  { %s417_s0 = smov 128   ;;  %s418_s16 = smov 8  }
  0x24   :  { %61 = dma.hbm_to_vmem [thread:$0]  %s503_s6, 512, %s56_s15, [#allocation11], %s417_s0, %s417_s0, %s418_s16  }
  0x25   :  { %405 = dma.done.wait [#allocation8], 16  }
  0x26   :  { %406 = vsyncadd [#allocation8], 4294967280 }
  0x27   :  { %407 = dma.done.wait [#allocation6], 128  }
  0x28   :  { %408 = vsyncadd [#allocation6], 4294967168 }
  0x29   :  { %409 = dma.done.wait [#allocation11], 640  }
  0x2a   :  { %410 = vsyncadd [#allocation11], 4294966656 }
  0x2b   :  { %74 = sfence }
  0x2c   :  { %v90_v0 = vld [vmem:[%s498_s1] sm:$0xff]  ;;  %vm94_vm0 = vcmask 130048   ;;  %v419_v2 = vmov 0   ;;  %v106_v7 = vlaneseq  ;;  %v127_v14 = vld [vmem:[#allocation9] sm:$0xff]  ;;  %v130_v17 = vld [vmem:[#allocation10] sm:$0xff]  ;;  %vm79_vm2 = vcmask 7168  }
  0x2d   :  { %v95_v1 = vsel %vm94_vm0, %v90_v0, -inf  ;;  %310 = vset.pattern.permute.xlu0 %v419_v2  ;;  %v93_v3 = vld [vmem:[%s499_s2] sm:$0xff]  ;;  %v137_v20 = vld [vmem:[#allocation12] sm:$0xff]  ;;  %v420_v22 = vmov 0.0   ;;  %v152_v25 = vld [vmem:[#allocation12 + $0x10] sm:$0xff]  ;;  %s251_s27 = sld [smem:[#allocation5]] }
  0x2e   :  { %96 = vmax.xlane.f32.xlu0 %v95_v1  ;;  %v481_v8 = vand.u32 127, %v106_v7  ;;  %v128_v15 = vld [vmem:[%s501_s4] sm:$0xff]  ;;  %80 = vst.msk [vmem:[#allocation2] sm:$0xff] %vm79_vm2, %v420_v22  ;;  %v160_v34 = vld [vmem:[#allocation12 + $0x18] sm:$0xff]  ;;  %s287_s4 = sld [smem:[#allocation5 + $0x1]]  ;;  %s421_s28 = smov [#allocation13]  }
  0x2f   :  { %v129_v16 = vsub.f32 %v127_v14, %v128_v15  ;;  %v144_v23 = vld [vmem:[#allocation12 + $0x8] sm:$0xff]  ;;  %s276_s29 = sshll.u32 %s421_s28, 4  ;;  %vm268_vm5 = vcmask 16384   ;;  %s277_s29 = int_to_ptr.vmem [resolvable:$true] %s276_s29 }
  0x30   :  { %vm265_vm3 = vcmp.eq.s32.totalorder %v481_v8, 1  ;;  %vm264_vm4 = vcmp.eq.s32.totalorder %v481_v8, 0  ;;  %s385_s30 = scalar_lea.vmem %s277_s29, 16  ;;  %s389_s8 = scalar_lea.vmem %s277_s29, 32 }
  0x31   :  { %v131_v18 = vmul.f32 %v130_v17, %v129_v16  ;;  %v138_v21 = vmul.f32 %v137_v20, %v129_v16  ;;  %v145_v24 = vmul.f32 %v144_v23, %v129_v16  ;;  %v153_v26 = vmul.f32 %v152_v25, %v129_v16  ;;  %p386_p1 = scmp.ne.s32.totalorder %s277_s29, %s385_s30  ;;  %p390_p2 = scmp.lt.s32.totalorder %s277_s29, %s277_s29 }
  0x32   :  { %v161_v37 = vmul.f32 %v160_v34, %v129_v16  ;;  %p391_p3 = scmp.lt.s32.totalorder %s389_s8, %s385_s30 }
  0x33   :  { %v133_v19 = vmul.f32 %v131_v18, %v129_v16 }
  0x34   :  { %v256_v17 = vstv %s287_s4  ;;  %p392_p4 = por %p391_p3, %p390_p2 }
  0x35   :  { %v120_v31 = vld [vmem:[#allocation2] sm:$0xff] }
  0x36   :  { %p393_p5 = pnand %p392_p4, %p386_p1 }
  0x44   :  { %109 = vperm.xlu0 %310, %v93_v3  }
  0xb7   :  { %v97_v4 = vpop.xlane.xlu0 %96 }
  0xb8   :  { %v98_v5 = vsub.f32 %v90_v0, %v97_v4 }
  0xba   :  { %v99_v6 = vmul.f32 1.442695, %v98_v5 }
  0xbc   :  { %311 = vpow2.f32 %v99_v6 }
  0xbf   :  { %v110_v9 = vpop.permute.xlu0 %109 }
  0xc0   :  { %vm111_vm1 = vcmp.eq.s32.totalorder %v481_v8, %v110_v9 }
  0xc1   :  { %v112_v12 = vsel %vm111_vm1, %v98_v5, 0.0 }
  0xc2   :  { %v113_v13 = vsel %vm94_vm0, %v112_v12, 0.0 }
  0xc9   :  { %v312_v10 = vpop.eup %311 }
  0xca   :  { %v101_v11 = vsel %vm94_vm0, %v312_v10, 0.0 }
  0xcb   :  { %102 = vadd.xlane.f32.xlu1 %v101_v11 }
  0xcf   :  { %114 = vadd.xlane.f32.xlu1 %v113_v13 }
  0xd3   :  { %185 = vadd.xlane.f32.xlu1 %v133_v19 }
  0xd7   :  { %196 = vadd.xlane.f32.xlu1 %v138_v21 }
  0xdb   :  { %210 = vadd.xlane.f32.xlu1 %v145_v24 }
  0xdf   :  { %224 = vadd.xlane.f32.xlu1 %v153_v26 }
 0x154   :  { %v103_v27 = vpop.xlane.xlu1 %102 }
 0x155   :  { %313 = vlog2.f32 %v103_v27 }
 0x156   :  { %315 = vrcp.f32 %v256_v17 }
 0x158   :  { %v115_v30 = vpop.xlane.xlu1 %114 }
 0x15c   :  { %v186_v38 = vpop.xlane.xlu1 %185 }
 0x15d   :  { %v187_v41 = vrot.slane %v186_v38, 4 }
 0x15f   :  { %v188_v46 = vadd.f32 %v187_v41, %v186_v38 }
 0x160   :  { %v197_v39 = vpop.xlane.xlu1 %196 }
 0x161   :  { %v198_v43 = vrot.slane %v197_v39, 4  ;;  %v189_v50 = vrot.slane %v188_v46, 2 }
 0x162   :  { %v314_v28 = vpop.eup %313 }
 0x163   :  { %v105_v29 = vmul.f32 0.6931472, %v314_v28  ;;  %v199_v47 = vadd.f32 %v198_v43, %v197_v39  ;;  %v190_v58 = vadd.f32 %v189_v50, %v188_v46 }
 0x164   :  { %v211_v40 = vpop.xlane.xlu1 %210 }
 0x165   :  { %v122_v32 = vsub.f32 %v105_v29, %v115_v30  ;;  %v212_v44 = vrot.slane %v211_v40, 4  ;;  %v200_v52 = vrot.slane %v199_v47, 2  ;;  %v191_v2 = vrot.slane %v190_v58, 1 }
 0x167   :  { %v124_v33 = vadd.f32 %v122_v32, %v120_v31  ;;  %v213_v48 = vadd.f32 %v212_v44, %v211_v40  ;;  %v201_v61 = vadd.f32 %v200_v52, %v199_v47  ;;  %v192_v11 = vadd.f32 %v191_v2, %v190_v58 }
 0x168   :  { %v225_v42 = vpop.xlane.xlu1 %224  ;;  %v253_v31 = vstv %s251_s27 }
 0x169   :  { %126 = vst.msk [vmem:[#allocation2] sm:$0xff] %vm79_vm2, %v124_v33  ;;  %v226_v45 = vrot.slane %v225_v42, 4  ;;  %v214_v54 = vrot.slane %v213_v48, 2  ;;  %v202_v5 = vrot.slane %v201_v61, 1  ;;  %v316_v33 = vpop.eup %315 }
 0x16b   :  { %v227_v49 = vadd.f32 %v226_v45, %v225_v42  ;;  %v215_v62 = vadd.f32 %v214_v54, %v213_v48  ;;  %v203_v12 = vadd.f32 %v202_v5, %v201_v61 }
 0x16d   :  { %v228_v55 = vrot.slane %v227_v49, 2  ;;  %v216_v6 = vrot.slane %v215_v62, 1 }
 0x16f   :  { %v229_v1 = vadd.f32 %v228_v55, %v227_v49  ;;  %v217_v14 = vadd.f32 %v216_v6, %v215_v62 }
 0x170   :  { %v170_v35 = vld [vmem:[#allocation2] sm:$0xff] }
 0x171   :  { %v172_v36 = vsel %vm79_vm2, %v170_v35, 0.0  ;;  %v230_v10 = vrot.slane %v229_v1, 1 }
 0x172   :  { %173 = vadd.xlane.f32.xlu1 %v172_v36 }
 0x173   :  { %v231_v15 = vadd.f32 %v230_v10, %v229_v1 }
 0x176   :  { %238 = vadd.xlane.f32.xlu1 %v161_v37 }
 0x1fb   :  { %v174_v51 = vpop.xlane.xlu1 %173 }
 0x1fc   :  { %v175_v53 = vrot.slane %v174_v51, 4 }
 0x1fe   :  { %v176_v56 = vadd.f32 %v175_v53, %v174_v51 }
 0x1ff   :  { %v239_v57 = vpop.xlane.xlu1 %238 }
 0x200   :  { %v177_v59 = vrot.slane %v176_v56, 2  ;;  %v240_v60 = vrot.slane %v239_v57, 4 }
 0x202   :  { %v241_v63 = vadd.f32 %v240_v60, %v239_v57  ;;  %v178_v0 = vadd.f32 %v177_v59, %v176_v56 }
 0x204   :  { %v242_v3 = vrot.slane %v241_v63, 2  ;;  %v179_v4 = vrot.slane %v178_v0, 1 }
 0x206   :  { %v243_v7 = vadd.f32 %v242_v3, %v241_v63  ;;  %v180_v9 = vadd.f32 %v179_v4, %v178_v0 }
 0x208   :  { %289 = vpush %v180_v9  ;;  %v244_v13 = vrot.slane %v243_v7, 1 }
 0x209   :  { %291 = vpush %v192_v11 }
 0x20a   :  { %293 = vpush %v203_v12  ;;  %v245_v16 = vadd.f32 %v244_v13, %v243_v7 }
 0x20b   :  { %295 = vpush %v217_v14 }
 0x20c   :  { %297 = vpush %v231_v15 }
 0x20d   :  { %299 = vpush %v245_v16 }
 0x239   :  { %s290_s6 = spop %289 }
 0x23a   :  { %s292_s22 = spop %291  ;;  %v182_v35 = vstv %s290_s6 }
 0x23b   :  { %s294_s23 = spop %293  ;;  %v194_v29 = vstv %s292_s22  ;;  %v183_v37 = vmul.f32 0.125, %v182_v35 }
 0x23c   :  { %v205_v18 = vstv %s294_s23  ;;  %s296_s24 = spop %295 }
 0x23d   :  { %v206_v19 = vmul.f32 %v205_v18, %v205_v18  ;;  %v219_v20 = vstv %s296_s24  ;;  %s298_s25 = spop %297 }
 0x23e   :  { %v220_v21 = vmul.f32 %v219_v20, %v219_v20  ;;  %v233_v22 = vstv %s298_s25  ;;  %s300_s26 = spop %299 }
 0x23f   :  { %v247_v23 = vstv %s300_s26  ;;  %v234_v25 = vmul.f32 %v233_v22, %v233_v22 }
 0x240   :  { %v221_v24 = vadd.f32 %v220_v21, %v206_v19  ;;  %v248_v26 = vmul.f32 %v247_v23, %v247_v23 }
 0x242   :  { %v235_v27 = vadd.f32 %v234_v25, %v221_v24 }
 0x244   :  { %v249_v28 = vadd.f32 %v248_v26, %v235_v27 }
 0x246   :  { %v250_v30 = vsub.f32 %v194_v29, %v249_v28 }
 0x248   :  { %v252_v32 = vmul.f32 0.5, %v250_v30 }
 0x24a   :  { %v254_v34 = vsub.f32 %v253_v31, %v252_v32 }
 0x24c   :  { %v258_v36 = vmul.f32 %v316_v33, %v254_v34 }
 0x24e   :  { %v288_v38 = vclamps-f32 %v258_v36, 1e+20 }
 0x250   :  { %v261_v39 = vsub.f32 %v183_v37, %v288_v38  ;;  %v266_v40 = vsel %vm265_vm3, %v183_v37, %v288_v38 }
 0x252   :  { %v267_v41 = vsel %vm264_vm4, %v261_v39, %v266_v40 }
 0x253   :  { %269 = vst.msk [vmem:[#allocation13] sm:$0x1] %vm268_vm5, %v267_v41 }
 0x254   :  { %396 = shalt.err (!%p393_p5)
}
 0x255   :  { %279 = dma.vmem_to_hbm [thread:$0]  %s277_s29, 16, %s504_s7, [#allocation7]  }
 0x256   :  { %411 = dma.done.wait [#allocation7], 16  }
 0x257   :  { %412 = vsyncadd [#allocation7], 4294967280 }
 0x258   :  { %283 = vsyncpa [#allocation6], 1 }
 0x259   :  { %284 = vsyncpa [#allocation11], 1 }
 0x25a   :  { %285 = vsyncpa [#allocation7], 1 }
 0x25b   :  { %286 = vsyncpa [#allocation8], 1 }

</bundles_post_ra>
